<compile_context>
chip_gen: v7x
topology: tpu7x:2x2x1
jax: 0.10.0
libtpu: 0.0.40
codegen_flags: <defaults>
</compile_context>

<pallas_src>
import functools
import numpy as np
import jax
import jax.numpy as jnp
from jax import lax
from jax.experimental import pallas as pl
from jax.experimental.pallas import tpu as pltpu


def _round_up(a, m):
    return ((a + m - 1) // m) * m


def pnn_kernel(feat_ref, rhs_ref, w1p_ref, b1_ref, w2_ref, b2_ref, out_ref, *, pkp):
    # feat_ref: [TB, Dfeat]        bf16  (dense features + flattened embeddings)
    # rhs_ref : [Dfeat, 2*PKp+Dm]  bf16  == [S_row | S_col | W1_lin]
    # w1p_ref : [PKp, Dm]          bf16  == K-row-repeated pair weights, 0-padded
    # b1_ref  : [1, Dm] f32, w2_ref: [1, Dm] bf16, b2_ref: [1, 1] f32
    feat = feat_ref[...]

    # One fused MXU pass: pairwise row/col selections q, p and the linear part
    # of the first layer, accumulated in f32.
    big = jnp.dot(feat, rhs_ref[...], preferred_element_type=jnp.float32)
    q = big[:, :pkp]                # [TB, PKp] (cols >= P*K are exactly zero)
    p_ = big[:, pkp:2 * pkp]        # [TB, PKp]
    h = big[:, 2 * pkp:]            # [TB, Dm]  == feat @ W1_lin

    # Pairwise inner products (f32 on the VPU) + their layer-1 contribution
    # on the MXU (bf16 operands, f32 accumulation).
    qp = (q * p_).astype(jnp.bfloat16)
    h = h + jnp.dot(qp, w1p_ref[...], preferred_element_type=jnp.float32)

    h = jnp.maximum(h + b1_ref[...], 0.0)          # [TB, Dm], f32

    # Output head: contract against the [1, Dm] row so the per-tile result is
    # lane-dense ([1, TB], batch on lanes) -> unmasked stores.
    logits = lax.dot_general(w2_ref[...], h.astype(jnp.bfloat16),
                             (((1,), (1,)), ((), ())),
                             preferred_element_type=jnp.float32)   # [1, TB]
    logits = logits + b2_ref[...]
    out_ref[...] = jax.nn.sigmoid(logits).reshape(out_ref.shape)


def pnn_forward(x, emb_tables, w1, b1, w2, b2, *, num_dense, k, block_b=4096):
    """x: [B, num_dense + F] float32 (sparse columns hold integer-valued indices)."""
    B = x.shape[0]
    F = len(emb_tables)
    K = k
    Dd = num_dense
    Dm = w1.shape[0]
    P = F * (F - 1) // 2
    FK = F * K
    PK = P * K
    Dfeat = Dd + FK
    assert Dm == Dfeat + P
    PKp = _round_up(PK, 128)        # lane-tile aligned halves -> no in-kernel shuffles

    # ---- glue (plain JAX): split input + per-field embedding gather ----
    # TODO(synk): the gather could move in-kernel (scalar-prefetch indices +
    # VMEM-resident tables); kept in XLA here for robust lowering.
    x_dense = x[:, :Dd].astype(jnp.bfloat16)                      # [B, Dd]
    x_sparse = x[:, Dd:].astype(jnp.int32)                        # [B, F]
    z = jnp.concatenate(
        [jnp.take(tbl, x_sparse[:, i], axis=0) for i, tbl in enumerate(emb_tables)],
        axis=1).astype(jnp.bfloat16)                              # [B, F*K] field-major
    feat = jnp.concatenate([x_dense, z], axis=1)                  # [B, Dfeat] bf16

    # ---- static pair bookkeeping (matches the PyTorch nested i<j loop order) --
    # Built with numpy so it folds into compile-time constants under jit.
    row, col = [], []
    for i in range(F - 1):
        for j in range(i + 1, F):
            row.append(i)
            col.append(j)
    sel = np.zeros((Dfeat, 2 * PKp), np.float32)
    for pi in range(P):
        for kk in range(K):
            sel[Dd + row[pi] * K + kk, pi * K + kk] = 1.0               # S_row
            sel[Dd + col[pi] * K + kk, PKp + pi * K + kk] = 1.0         # S_col

    # Fused rhs = [S_row(pad128) | S_col(pad128) | W1_lin]   -> (Dfeat, 2*PKp+Dm)
    rhs = jnp.concatenate(
        [jnp.asarray(sel, jnp.bfloat16), w1[:Dfeat, :].astype(jnp.bfloat16)], axis=1)

    # K-row-repeated pair weights, zero-padded to a full 128-row tile.
    w1_pair = jnp.repeat(w1[Dfeat:, :], K, axis=0).astype(jnp.bfloat16)   # [P*K, Dm]
    if PKp > PK:
        w1_pair = jnp.concatenate(
            [w1_pair, jnp.zeros((PKp - PK, Dm), jnp.bfloat16)], axis=0)   # [PKp, Dm]

    w2_row = w2.reshape(1, Dm).astype(jnp.bfloat16)
    b1f = b1.reshape(1, Dm).astype(jnp.float32)
    b2f = b2.reshape(1, 1).astype(jnp.float32)

    # ---- batch tiling ----
    Bp0 = _round_up(B, 8)
    TB = min(block_b, Bp0)
    # Keep at least 2 tiles when possible so v7x's two TensorCores both get work
    # (near-free extra grid step on v5e/v6e).
    if Bp0 >= 16 and Bp0 <= TB:
        TB = _round_up(-(-Bp0 // 2), 8)
    Bp = _round_up(Bp0, TB)
    G = Bp // TB
    if Bp != B:
        feat = jnp.pad(feat, ((0, Bp - B), (0, 0)))

    # VMEM budget: padded per-row intermediates (big f32, qp, h, bf16 copies,
    # double-buffered feat) + small resident weights; clamp below v7x physical.
    Dmp = _round_up(Dm, 128)
    bytes_per_row = (4 * (2 * PKp + Dmp)        # big (f32)
                     + 6 * PKp + 6 * Dmp        # qp / h (f32 + bf16)
                     + 4 * _round_up(Dfeat, 128))  # feat bf16, double-buffered
    vmem_limit = int(min(max(32 << 20, 2 * TB * bytes_per_row + (4 << 20)), 56 << 20))

    kernel = functools.partial(pnn_kernel, pkp=PKp)
    out = pl.pallas_call(
        kernel,
        out_shape=jax.ShapeDtypeStruct((G, 1, TB), jnp.float32),
        grid=(G,),
        in_specs=[
            pl.BlockSpec((TB, Dfeat), lambda i: (i, 0)),             # activations (tiled)
            pl.BlockSpec((Dfeat, 2 * PKp + Dm), lambda i: (0, 0)),   # fused [Srow|Scol|W1lin]
            pl.BlockSpec((PKp, Dm), lambda i: (0, 0)),               # pair weights (padded)
            pl.BlockSpec((1, Dm), lambda i: (0, 0)),                 # b1
            pl.BlockSpec((1, Dm), lambda i: (0, 0)),                 # w2 row
            pl.BlockSpec((1, 1), lambda i: (0, 0)),                  # b2
        ],
        out_specs=pl.BlockSpec((1, 1, TB), lambda i: (i, 0, 0)),
        compiler_params=pltpu.CompilerParams(
            dimension_semantics=("parallel",),
            vmem_limit_bytes=vmem_limit),
    )(feat, rhs, w1_pair, b1f, w2_row, b2f)

    return out.reshape(G * TB)[:B].reshape(B, 1)


def pnn_reference(x, emb_tables, w1, b1, w2, b2, *, num_dense, k):
    """Straightforward f32 JAX transcription of the PyTorch forward (for checking)."""
    F = len(emb_tables)
    x_dense = x[:, :num_dense].astype(jnp.float32)
    x_sparse = x[:, num_dense:].astype(jnp.int32)
    emb = jnp.stack(
        [jnp.take(t, x_sparse[:, i], axis=0) for i, t in enumerate(emb_tables)],
        axis=1)                                                  # [B, F, K]
    z = emb.reshape(emb.shape[0], F * k)
    pairs = []
    for i in range(F - 1):
        for j in range(i + 1, F):
            pairs.append(jnp.sum(emb[:, i, :] * emb[:, j, :], axis=-1, keepdims=True))
    dnn_in = jnp.concatenate([x_dense, z] + pairs, axis=1)
    h = jnp.maximum(dnn_in @ w1 + b1, 0.0)
    return jax.nn.sigmoid(h @ w2 + b2)


if __name__ == "__main__":
    # Small synthetic config (mirrors feature_columns = (dense_cols, sparse_cols)).
    B = 8                          # batch
    num_dense = 3                  # len(dense_feature_columns)
    vocab_sizes = [10, 7, 5, 12]   # field_feat_num per sparse feature
    F = len(vocab_sizes)           # sparse_field
    K = 8                          # embedding dim k
    Dm = F * (F - 1) // 2 + F * K + num_dense   # dense_dims = 6 + 32 + 3 = 41

    key = jax.random.PRNGKey(0)
    keys = jax.random.split(key, 12 + F)

    # Xavier-uniform embedding tables (deterministic).
    emb_tables = []
    for fi, vocab in enumerate(vocab_sizes):
        bound = (6.0 / (vocab + K)) ** 0.5
        emb_tables.append(
            jax.random.uniform(keys[fi], (vocab, K), jnp.float32, -bound, bound))

    # DNN: Linear(Dm, Dm) -> ReLU -> Linear(Dm, 1); weights stored [in, out].
    lin_bound = 1.0 / (Dm ** 0.5)
    w1 = jax.random.uniform(keys[F + 0], (Dm, Dm), jnp.float32, -lin_bound, lin_bound)
    b1 = jax.random.uniform(keys[F + 1], (1, Dm), jnp.float32, -lin_bound, lin_bound)
    w2 = jax.random.uniform(keys[F + 2], (Dm, 1), jnp.float32, -lin_bound, lin_bound)
    b2 = jax.random.uniform(keys[F + 3], (1, 1), jnp.float32, -lin_bound, lin_bound)

    # Model input: dense floats + sparse integer indices packed into one float array.
    x_dense_part = jax.random.normal(keys[F + 4], (B, num_dense), jnp.float32)
    sparse_idx = jnp.stack(
        [jax.random.randint(keys[F + 5 + i], (B,), 0, vocab_sizes[i]) for i in range(F)],
        axis=1).astype(jnp.float32)
    x = jnp.concatenate([x_dense_part, sparse_idx], axis=1)      # [B, num_dense + F]

    # Jit the wrapper so the static host prep (selection matrices, repeats)
    # folds into compile-time constants.
    fwd = jax.jit(functools.partial(pnn_forward, num_dense=num_dense, k=K))
    out = jax.block_until_ready(fwd(x, emb_tables, w1, b1, w2, b2))
    assert out.shape == (B, 1) and out.dtype == jnp.float32

    ref = jax.block_until_ready(
        pnn_reference(x, emb_tables, w1, b1, w2, b2, num_dense=num_dense, k=K))
    # bf16 MXU operands with f32 accumulation -> loosened tolerance.
    assert jnp.allclose(out, ref, atol=2e-2), (out, ref)

    print("KERNEL_OK")
</pallas_src>

<mosaic_0001>
module attributes {stable_mosaic.version = 11 : i64} {
  func.func @pnn_kernel(%arg0: i32, %arg1: memref<8x35xbf16, #tpu.memory_space<vmem>>, %arg2: memref<35x297xbf16, #tpu.memory_space<vmem>>, %arg3: memref<128x41xbf16, #tpu.memory_space<vmem>>, %arg4: memref<1x41xf32, #tpu.memory_space<vmem>>, %arg5: memref<1x41xbf16, #tpu.memory_space<vmem>>, %arg6: memref<1x1xf32, #tpu.memory_space<vmem>>, %arg7: memref<1x1x8xf32, #tpu.memory_space<vmem>>) attributes {dimension_semantics = [#tpu.dimension_semantics<parallel>], iteration_bounds = array<i64: 1>, scalar_prefetch = 0 : i64, scratch_operands = 0 : i64, tpu.core_type = #tpu.core_type<tc>, window_params = [{transform_indices = @transform_0, window_bounds = array<i64: 8, 35>}, {pipeline_mode = #tpu.pipeline_mode<synchronous>, transform_indices = @transform_1, window_bounds = array<i64: 35, 297>}, {pipeline_mode = #tpu.pipeline_mode<synchronous>, transform_indices = @transform_2, window_bounds = array<i64: 128, 41>}, {pipeline_mode = #tpu.pipeline_mode<synchronous>, transform_indices = @transform_3, window_bounds = array<i64: 1, 41>}, {pipeline_mode = #tpu.pipeline_mode<synchronous>, transform_indices = @transform_4, window_bounds = array<i64: 1, 41>}, {pipeline_mode = #tpu.pipeline_mode<synchronous>, transform_indices = @transform_5, window_bounds = array<i64: 1, 1>}, {transform_indices = @transform_6, window_bounds = array<i64: 1, 1, 8>}]} {
    %c0 = arith.constant 0 : index
    %c0_0 = arith.constant 0 : index
    %0 = vector.load %arg1[%c0, %c0_0] : memref<8x35xbf16, #tpu.memory_space<vmem>>, vector<8x35xbf16>
    %c0_1 = arith.constant 0 : index
    %c0_2 = arith.constant 0 : index
    %1 = vector.load %arg2[%c0_1, %c0_2] : memref<35x297xbf16, #tpu.memory_space<vmem>>, vector<35x297xbf16>
    %cst = arith.constant dense<0.000000e+00> : vector<8x297xf32>
    %2 = tpu.matmul %0, %1, %cst {dimension_numbers = #tpu.dot_dimension_numbers<[1], [0], [0], [1], [0, 0, 1, 1], [], []>} : vector<8x35xbf16>, vector<35x297xbf16>, vector<8x297xf32> -> vector<8x297xf32>
    %3 = vector.extract_strided_slice %2 {offsets = [0, 0], sizes = [8, 128], strides = [1, 1]} : vector<8x297xf32> to vector<8x128xf32>
    %4 = vector.extract_strided_slice %2 {offsets = [0, 128], sizes = [8, 128], strides = [1, 1]} : vector<8x297xf32> to vector<8x128xf32>
    %5 = vector.extract_strided_slice %2 {offsets = [0, 256], sizes = [8, 41], strides = [1, 1]} : vector<8x297xf32> to vector<8x41xf32>
    %6 = arith.mulf %3, %4 : vector<8x128xf32>
    %7 = arith.truncf %6 : vector<8x128xf32> to vector<8x128xbf16>
    %c0_3 = arith.constant 0 : index
    %c0_4 = arith.constant 0 : index
    %8 = vector.load %arg3[%c0_3, %c0_4] : memref<128x41xbf16, #tpu.memory_space<vmem>>, vector<128x41xbf16>
    %cst_5 = arith.constant dense<0.000000e+00> : vector<8x41xf32>
    %9 = tpu.matmul %7, %8, %cst_5 {dimension_numbers = #tpu.dot_dimension_numbers<[1], [0], [0], [1], [0, 0, 1, 1], [], []>} : vector<8x128xbf16>, vector<128x41xbf16>, vector<8x41xf32> -> vector<8x41xf32>
    %10 = arith.addf %5, %9 : vector<8x41xf32>
    %c0_6 = arith.constant 0 : index
    %c0_7 = arith.constant 0 : index
    %11 = vector.load %arg4[%c0_6, %c0_7] : memref<1x41xf32, #tpu.memory_space<vmem>>, vector<1x41xf32>
    %12 = vector.broadcast %11 : vector<1x41xf32> to vector<8x41xf32>
    %13 = arith.addf %10, %12 : vector<8x41xf32>
    %cst_8 = arith.constant 0.000000e+00 : f32
    %14 = vector.broadcast %cst_8 : f32 to vector<8x41xf32>
    %15 = arith.maximumf %13, %14 : vector<8x41xf32>
    %c0_9 = arith.constant 0 : index
    %c0_10 = arith.constant 0 : index
    %16 = vector.load %arg5[%c0_9, %c0_10] : memref<1x41xbf16, #tpu.memory_space<vmem>>, vector<1x41xbf16>
    %17 = arith.truncf %15 : vector<8x41xf32> to vector<8x41xbf16>
    %cst_11 = arith.constant dense<0.000000e+00> : vector<1x8xf32>
    %18 = tpu.matmul %16, %17, %cst_11 {dimension_numbers = #tpu.dot_dimension_numbers<[1], [1], [0], [0], [0, 0, 1, 0], [], []>} : vector<1x41xbf16>, vector<8x41xbf16>, vector<1x8xf32> -> vector<1x8xf32>
    %c0_12 = arith.constant 0 : index
    %c0_13 = arith.constant 0 : index
    %19 = vector.load %arg6[%c0_12, %c0_13] : memref<1x1xf32, #tpu.memory_space<vmem>>, vector<1x1xf32>
    %20 = vector.broadcast %19 : vector<1x1xf32> to vector<1x8xf32>
    %21 = arith.addf %18, %20 : vector<1x8xf32>
    %22 = arith.negf %21 : vector<1x8xf32>
    %23 = math.exp %22 : vector<1x8xf32>
    %cst_14 = arith.constant 1.000000e+00 : f32
    %24 = vector.broadcast %cst_14 : f32 to vector<1x8xf32>
    %25 = arith.addf %24, %23 : vector<1x8xf32>
    %26 = arith.divf %24, %25 : vector<1x8xf32>
    %27 = vector.shape_cast %26 : vector<1x8xf32> to vector<1x1x8xf32>
    %c0_15 = arith.constant 0 : index
    %c0_16 = arith.constant 0 : index
    %c0_17 = arith.constant 0 : index
    %28 = vector.load %arg7[%c0_15, %c0_16, %c0_17] : memref<1x1x8xf32, #tpu.memory_space<vmem>>, vector<1x1x8xf32>
    tpu.vector_store %arg7[%c0_15, %c0_16, %c0_17], %27 {strides = array<i32>} : memref<1x1x8xf32, #tpu.memory_space<vmem>>, vector<1x1x8xf32>,
    return
  }
  func.func @transform_0(%arg0: i32) -> (i32, i32) {
    %c0_i32 = arith.constant 0 : i32
    %c0_i32_0 = arith.constant 0 : i32
    return %arg0, %c0_i32 : i32, i32
  }
  func.func @transform_1(%arg0: i32) -> (i32, i32) {
    %c0_i32 = arith.constant 0 : i32
    %c0_i32_0 = arith.constant 0 : i32
    %c0_i32_1 = arith.constant 0 : i32
    return %c0_i32, %c0_i32_0 : i32, i32
  }
  func.func @transform_2(%arg0: i32) -> (i32, i32) {
    %c0_i32 = arith.constant 0 : i32
    %c0_i32_0 = arith.constant 0 : i32
    %c0_i32_1 = arith.constant 0 : i32
    return %c0_i32, %c0_i32_0 : i32, i32
  }
  func.func @transform_3(%arg0: i32) -> (i32, i32) {
    %c0_i32 = arith.constant 0 : i32
    %c0_i32_0 = arith.constant 0 : i32
    %c0_i32_1 = arith.constant 0 : i32
    return %c0_i32, %c0_i32_0 : i32, i32
  }
  func.func @transform_4(%arg0: i32) -> (i32, i32) {
    %c0_i32 = arith.constant 0 : i32
    %c0_i32_0 = arith.constant 0 : i32
    %c0_i32_1 = arith.constant 0 : i32
    return %c0_i32, %c0_i32_0 : i32, i32
  }
  func.func @transform_5(%arg0: i32) -> (i32, i32) {
    %c0_i32 = arith.constant 0 : i32
    %c0_i32_0 = arith.constant 0 : i32
    %c0_i32_1 = arith.constant 0 : i32
    return %c0_i32, %c0_i32_0 : i32, i32
  }
  func.func @transform_6(%arg0: i32) -> (i32, i32, i32) {
    %c0_i32 = arith.constant 0 : i32
    %c0_i32_0 = arith.constant 0 : i32
    %c0_i32_1 = arith.constant 0 : i32
    return %arg0, %c0_i32, %c0_i32_0 : i32, i32, i32
  }
}

</mosaic_0001>

<bundles_post_ra>
// kernel: pnn_forward.1
= control target key start
LH: loop header
LB: loop body
LE: loop exit
PB: predicated region body
PF: predicated region fallthrough
CT: control target
= control target key end

     0   :  { %s613_s0 = inlined_call_operand.vmem [shape: bf16[8,35], index: 0, kind: input, shape index: {}]   ;;  %s614_s1 = inlined_call_operand.vmem [shape: bf16[35,297], index: 1, kind: input, shape index: {}]   ;;  %s615_s2 = inlined_call_operand.vmem [shape: bf16[128,41], index: 2, kind: input, shape index: {}]   ;;  %s616_s3 = inlined_call_operand.vmem [shape: f32[1,41], index: 3, kind: input, shape index: {}]   ;;  %s617_s4 = inlined_call_operand.vmem [shape: bf16[1,41], index: 4, kind: input, shape index: {}]   ;;  %s618_s5 = inlined_call_operand.<no memory space> [shape: f32[1,1], index: 5, kind: input, shape index: {}]   ;;  %s619_s6 = inlined_call_operand.hbm [shape: f32[1,1,8], index: 6, kind: output, shape index: {}]  }
   0x1   :  { %v11_v0 = vstv %s618_s5 }
   0x2   :  { %12 = vst [vmem:[#allocation2] sm:$0x1] %v11_v0 }
   0x3   :  { %v452_v1 = vld [vmem:[%s614_s1 + $0x4] ss:$12 sps:$4 sm:$0xff]   ;;  %vm82_vm0 = vcmask 1040384   ;;  %vm83_vm1 = vcmask 1041408   ;;  %v454_v2 = vld [vmem:[%s614_s1] ss:$12 sps:$4 sm:$0xff]  }
   0x4   :  { %95 = vmatprep.subr.bf16.mxu1 %v452_v1  ;;  %v455_v3 = vld [vmem:[%s614_s1 + $0x1c] ss:$12 sps:$4 sm:$0xff]   ;;  %v36_v4 = vld [vmem:[%s614_s1 + $0x30] sm:$0x33]  ;;  %v499_v5 = vmov 0   ;;  %v500_v8 = vmov 65535  }
   0x5   :  { %127 = vmatprep.mubr.bf16.mxu1 %v499_v5  ;;  %96 = vmatpush1.bf16.msra.mxu1 %v454_v2  ;;  %v457_v6 = vld [vmem:[%s614_s1 + $0x18] ss:$12 sps:$4 sm:$0xff]   ;;  %v380_v7 = vcombine.high %v36_v4, %v36_v4  ;;  %v84_v9 = vsel %vm82_vm0, 4294967295, %v500_v8  ;;  %v379_v10 = vcombine.low %v36_v4, %v36_v4  ;;  %v501_v14 = vmov 0.0   ;;  %v461_v15 = vld [vmem:[%s615_s2 + $0x8] sm:$0xff]   ;;  %v462_v18 = vld [vmem:[%s615_s2 + $0x10] sm:$0xff]  }
   0x6   :  { %451 = vset.pattern.permute.xlu0 %v499_v5  ;;  %97 = vmatprep.subr.bf16.mxu1 %v455_v3  ;;  %v85_v11 = vsel %vm83_vm1, %v84_v9, 0  ;;  %v460_v12 = vld [vmem:[%s615_s2] sm:$0xff]   ;;  %vm78_vm2 = vcmask 285696   ;;  %v465_v19 = vld [vmem:[%s614_s1 + $0x8] ss:$12 sps:$4 sm:$0xff]  }
   0x7   :  { %v90_v13 = vand.u32 %v380_v7, %v85_v11  ;;  %420 = vmatprep.subr.bf16.mxu0 %v501_v14  ;;  %v87_v16 = vand.u32 %v379_v10, %v85_v11  ;;  %v27_v17 = vld [vmem:[%s613_s0] sm:$0xf] }
   0x8   :  { %421 = vmatpush3.bf16.msra.mxu0 %v460_v12 }
   0x9   :  { %98 = vmatpush1.bf16.msra.mxu1 %v457_v6  ;;  %422 = vmatprep.subr.bf16.mxu0 %v501_v14 }
   0xa   :  { %99 = vmatprep.subr.bf16.mxu1 %v90_v13 }
   0xc   :  { %423 = vmatpush3.bf16.msra.mxu0 %v461_v15 }
   0xd   :  { %100 = vmatpush1.bf16.msra.mxu1 %v87_v16  ;;  %424 = vmatprep.subr.bf16.mxu0 %v501_v14 }
   0xe   :  { %410 = vmatprep.subr.bf16.mxu1 %v501_v14 }
   0xf   :  { %13 = vsyncpa [#allocation4], 0  ;;  %v463_v20 = vld [vmem:[%s615_s2 + $0x18] sm:$0xff]   ;;  %v467_v21 = vld [vmem:[%s614_s1 + $0x20] ss:$12 sps:$4 sm:$0xff]   ;;  %vm502_vm3 = vmmov 0   ;;  %v300_v50 = vlaneseq }
  0x10   :  { %382 = vmatmul.mubr.msk.bf16.vlgmr.msra.gmra.mrb[0].mxu1 %vm78_vm2, %v27_v17  ;;  %425 = vmatpush3.bf16.msra.mxu0 %v462_v18  ;;  %v464_v22 = vld [vmem:[%s615_s2 + $0x20] sm:$0xff]   ;;  %v466_v23 = vld [vmem:[%s615_s2 + $0x28] sm:$0xff]   ;;  %v468_v24 = vld [vmem:[%s615_s2 + $0x30] sm:$0xff]   ;;  %vm304_vm4 = vcmask 334848   ;;  %vm357_vm5 = vcmask 57344  }
  0x11   :  { %426 = vmatprep.subr.bf16.mxu0 %v501_v14  ;;  %411 = vmatpush3.bf16.msra.mxu1 %v465_v19  ;;  %v469_v25 = vld [vmem:[%s614_s1 + $0x38] ss:$0 sps:$4 sm:$0x33]   ;;  %v294_v38 = vld [vmem:[#allocation2] sm:$0x1]  ;;  %v301_v51 = vshrl.u32 %v300_v50, 7 }
  0x12   :  { %412 = vmatprep.subr.bf16.mxu1 %v501_v14  ;;  %v93_v26 = vand.u32 %v469_v25, %v85_v11  ;;  %v470_v27 = vld [vmem:[%s615_s2 + $0x38] sm:$0xff]   ;;  %416 = vmatprep.mubr.msk.bf16.mxu1 %vm502_vm3, %v501_v14  ;;  %v392_v40 = vld [vmem:[%s616_s3] ss:$0 sm:$0xff]  ;;  %s503_s3 = smov [#allocation3]  }
  0x13   :  { %436 = vmatprep.mubr.msk.bf16.mxu0 %vm502_vm3, %v501_v14  ;;  %297 = vperm.xlu0 %451, %v294_v38   ;;  %v292_v49 = vld [vmem:[%s617_s4] sm:$0x1]  ;;  %v302_v52 = vsub.s32 0, %v301_v51  ;;  %s365_s8 = sshll.u32 %s503_s3, 4  ;;  %s366_s8 = int_to_ptr.vmem [resolvable:$true] %s365_s8 }
  0x14   :  { %427 = vmatpush3.bf16.msra.mxu0 %v463_v20  ;;  %s475_s4 = scalar_lea.vmem %s366_s8, 16  ;;  %s479_s9 = scalar_lea.vmem %s366_s8, 32 }
  0x15   :  { %428 = vmatprep.subr.bf16.mxu0 %v501_v14  ;;  %413 = vmatpush3.bf16.msra.mxu1 %v467_v21  ;;  %p476_p0 = scmp.ne.s32.totalorder %s366_s8, %s475_s4  ;;  %p480_p1 = scmp.lt.s32.totalorder %s366_s8, %s366_s8 }
  0x16   :  { %414 = vmatprep.subr.bf16.mxu1 %v501_v14  ;;  %p481_p2 = scmp.lt.s32.totalorder %s479_s9, %s475_s4 }
  0x18   :  { %429 = vmatpush3.bf16.msra.mxu0 %v464_v22  ;;  %p482_p3 = por %p481_p2, %p480_p1 }
  0x19   :  { %430 = vmatprep.subr.bf16.mxu0 %v501_v14  ;;  %415 = vmatpush3.bf16.msra.mxu1 %v93_v26 }
  0x1a   :  { %440 = vmatprep.subr.bf16.mxu1 %v501_v14  ;;  %p483_p4 = pnand %p482_p3, %p476_p0 }
  0x1c   :  { %431 = vmatpush3.bf16.msra.mxu0 %v466_v23  ;;  %417 = vmatmul.mubr.msk.bf16.vlgmr.msra.gmra.mrb[4].mxu1 %vm78_vm2, %v27_v17 }
  0x1d   :  { %432 = vmatprep.subr.bf16.mxu0 %v501_v14  ;;  %442 = vmatprep.mubr.msk.bf16.mxu1 %vm502_vm3, %v501_v14 }
  0x20   :  { %433 = vmatpush3.bf16.msra.mxu0 %v468_v24 }
  0x21   :  { %434 = vmatprep.subr.bf16.mxu0 %v501_v14 }
  0x24   :  { %435 = vmatpush3.bf16.msra.mxu0 %v470_v27 }
  0x92   :  { %v298_v53 = vpop.permute.xlu0 %297 }
  0x93   :  { %v303_v54 = vrot.slane %v298_v53, %v302_v52 }
  0xe3   :  { %v129_v28 = vpop.f32.mrb[0].mxu1 }
  0xe4   :  { %v131_v29 = vpop.f32.mrb[1].mxu1 }
  0xe5   :  { %v176_v30 = vmul.f32 %v131_v29, %v129_v28  ;;  %v133_v31 = vpop.f32.mrb[2].mxu1 }
  0xe6   :  { %v134_v32 = vpop.f32.mrb[3].mxu1 }
  0xe7   :  { %v177_v33 = vpack.c.bf16 %v176_v30, %v176_v30 }
  0xe9   :  { %437 = vmatmul.mubr.bf16.vlgmr.msra.gmra.mrb[0].mxu0 %v177_v33 }
  0xef   :  { %v170_v34 = vpop.f32.mrb[4].mxu1 }
  0xf0   :  { %v418_v35 = vpop.f32.mrb[5].mxu1 }
  0xf1   :  { %v173_v36 = vpop.f32.mrb[6].mxu1 }
  0xf2   :  { %v419_v37 = vpop.f32.mrb[7].mxu1 }
 0x1bc   :  { %v276_v39 = vpop.f32.mrb[0].mxu0 }
 0x1bd   :  { %v282_v41 = vadd.f32 %v276_v39, %v170_v34  ;;  %v438_v42 = vpop.f32.mrb[1].mxu0 }
 0x1be   :  { %v279_v43 = vpop.f32.mrb[2].mxu0 }
 0x1bf   :  { %v290_v44 = vadd.f32 %v392_v40, %v282_v41  ;;  %v439_v45 = vpop.f32.mrb[3].mxu0 }
 0x1c1   :  { %v291_v46 = vmax.f32 %v290_v44, 0.0 }
 0x1c3   :  { %v293_v47 = vpack.c.bf16 %v291_v46, %v291_v46 }
 0x1c5   :  { %v309_v48 = vsel %vm304_vm4, %v293_v47, 0 }
 0x1c6   :  { %441 = vmatpush3.bf16.xpose.msra.mxu1 %v309_v48 }
 0x1cd   :  { %443 = vmatmul.mubr.msk.bf16.vlgmr.msra.gmra.mrb[8].mxu1 %vm304_vm4, %v292_v49 }
 0x2a0   :  { %v345_v55 = vpop.f32.mrb[8].mxu1 }
 0x2a1   :  { %v346_v56 = vadd.f32 %v345_v55, %v303_v54  ;;  %v444_v57 = vpop.f32.mrb[9].mxu1 }
 0x2a2   :  { %v348_v58 = vpop.f32.mrb[10].mxu1 }
 0x2a3   :  { %v394_v59 = vmul.f32 -1.442695, %v346_v56  ;;  %v445_v60 = vpop.f32.mrb[11].mxu1 }
 0x2a5   :  { %471 = vpow2.f32 %v394_v59 }
 0x2af   :  { %v472_v61 = vpop.eup %471 }
 0x2b0   :  { %v354_v62 = vadd.f32 1.0, %v472_v61 }
 0x2b2   :  { %473 = vrcp.f32 %v354_v62 }
 0x2bc   :  { %v474_v63 = vpop.eup %473 }
 0x2bd   :  { %358 = vst.msk [vmem:[#allocation3] sm:$0x1] %vm357_vm5, %v474_v63 }
 0x2be   :  { %486 = shalt.err (!%p483_p4)
}
 0x2bf   :  { %s487_s12 = scalar_lea.hbm %s619_s6, 16 }
 0x2c0   :  { %p488_p5 = scmp.ne.s32.totalorder %s619_s6, %s487_s12  ;;  %p491_p6 = scmp.lt.u32.totalorder %s487_s12, %s619_s6 }
 0x2c2   :  { %p493_p7 = pnand %p491_p6, %p488_p5 }
 0x2c4   :  { %496 = shalt.err (!%p493_p7)
}
 0x2c5   :  { %368 = dma.vmem_to_hbm [thread:$0]  %s366_s8, 16, %s619_s6, [#allocation4]  }
 0x2c6   :  { %497 = dma.done.wait [#allocation4], 16  }
 0x2c7   :  { %498 = vsyncadd [#allocation4], 4294967280 }
 0x2c8   :  { %372 = vsyncpa [#allocation4], 1 }

</bundles_post_ra>
